<compile_context>
chip_gen: v7x
topology: tpu7x:2x2x1
jax: 0.10.0
libtpu: 0.0.40
codegen_flags: <defaults>
</compile_context>

<pallas_src>
import functools
import math
from typing import NamedTuple

import jax
import jax.numpy as jnp
from jax.experimental import pallas as pl
from jax.experimental.pallas import tpu as pltpu


def _round_up(x, m):
    return ((x + m - 1) // m) * m


def _cdiv(a, b):
    return -(-a // b)


def _layer_dims(meta_dim, z_dim):
    """(fan_in, fan_out) of the 15 Linear layers, in execution order."""
    z4, z2 = z_dim // 4, z_dim // 2
    dims = [(meta_dim, z4)]
    dims += [(z4, z4)] * 4        # ResBlock(z4, z4) x2  (2 linears each)
    dims += [(z4, z2)]
    dims += [(z2, z2)] * 4        # ResBlock(z2, z2) x2
    dims += [(z2, z_dim)]
    dims += [(z_dim, z_dim)] * 4  # ResBlock(z, z) x2
    return dims


def _forward_chain(h, linear, relu, add):
    """Shared layer ordering: Linear, 2xResBlock, Linear, 2xResBlock, Linear, 2xResBlock."""
    def resblock(h, i):
        r = linear(relu(h), i)       # ReLU -> Linear
        r = linear(relu(r), i + 1)   # ReLU -> Linear
        return add(h, r)             # residual

    idx = 0
    h = linear(h, idx); idx += 1
    h = resblock(h, idx); idx += 2
    h = resblock(h, idx); idx += 2
    h = linear(h, idx); idx += 1
    h = resblock(h, idx); idx += 2
    h = resblock(h, idx); idx += 2
    h = linear(h, idx); idx += 1
    h = resblock(h, idx); idx += 2
    h = resblock(h, idx); idx += 2
    return h


# ---------------------------------------------------------------------------
# Kernel
# ---------------------------------------------------------------------------
def _meta_embedding_kernel(x_ref, w_ref, b_ref, o_ref, *, dims, z_pad, chunk, streams):
    """x_ref: (F, tb)  w_ref: (L, F, F)  b_ref: (L, F, 1)  o_ref: (F, tb).

    `dims` are the padded per-layer (fan_in, fan_out); all static Python ints.
    The batch tile is processed in spans of `streams * chunk` lanes; the
    `streams` chunks within a span are traced interleaved so the scheduler can
    overlap MXU / VPU work of independent chains.
    """
    F = w_ref.shape[1]
    tb = x_ref.shape[1]
    span = chunk * streams
    n_steps = tb // span
    fi0 = dims[0][0]
    cdt = w_ref.dtype                       # matmul operand dtype (bf16 default)

    def linear(hs, i):
        fi, fo = dims[i]
        w = w_ref[i, :fo, :fi]              # true-width static slice, already cdt
        b = b_ref[i, :fo, :]                # (fo, 1) f32, broadcasts over lanes
        return [jnp.dot(w, h.astype(cdt), preferred_element_type=jnp.float32) + b
                for h in hs]

    def relu(hs):
        return [jnp.maximum(h, 0.0) for h in hs]

    def add(hs, rs):
        return [h + r for h, r in zip(hs, rs)]

    for s in range(n_steps):                # static loop, static lane offsets
        base = s * span
        hs = [x_ref[:fi0, base + c * chunk: base + (c + 1) * chunk]
              .astype(jnp.float32) for c in range(streams)]
        hs = _forward_chain(hs, linear, relu, add)
        for c in range(streams):
            lo, hi = base + c * chunk, base + (c + 1) * chunk
            if z_pad == F:
                o_ref[:, lo:hi] = hs[c]     # lane-dense, full-width store
            else:
                o_ref[:z_pad, lo:hi] = hs[c]
                o_ref[z_pad:, lo:hi] = jnp.zeros((F - z_pad, chunk), jnp.float32)


# ---------------------------------------------------------------------------
# Parameter packing (done ONCE, at parameter-load time — not per forward call)
# ---------------------------------------------------------------------------
class MetaEmbeddingParams(NamedTuple):
    wslab: jax.Array    # (L, F, F), compute dtype, (out, in) layout, zero padded
    bslab: jax.Array    # (L, F, 1), float32, zero padded
    dims: tuple         # per-layer padded (fan_in, fan_out), static ints
    z_dim: int
    meta_dim: int


def pack_params(weights, biases, meta_dim, z_dim, compute_dtype=jnp.bfloat16):
    """weights[i]: (fan_in, fan_out); biases[i]: (1, fan_out)  (y = x @ W + b)."""
    dims = _layer_dims(meta_dim, z_dim)
    L = len(dims)
    F = _round_up(max(max(p) for p in dims), 8)
    wslab = jnp.zeros((L, F, F), jnp.float32)
    bslab = jnp.zeros((L, F, 1), jnp.float32)
    for i, ((fi, fo), w, b) in enumerate(zip(dims, weights, biases)):
        wslab = wslab.at[i, :fo, :fi].set(jnp.asarray(w, jnp.float32).T)
        bslab = bslab.at[i, :fo, 0].set(jnp.asarray(b, jnp.float32).reshape(-1))
    dims_padded = tuple((_round_up(fi, 8), _round_up(fo, 8)) for fi, fo in dims)
    return MetaEmbeddingParams(wslab.astype(compute_dtype), bslab, dims_padded,
                               int(z_dim), int(meta_dim))


# ---------------------------------------------------------------------------
# Tiling heuristics
# ---------------------------------------------------------------------------
def _choose_batch_tiling(B, tb_req):
    """Pick (batch tile, padded batch). Batch lives on lanes -> multiples of 128."""
    B128 = _round_up(max(B, 1), 128)
    tb_req = max(128, _round_up(min(tb_req, B128), 128))
    steps = _cdiv(B128, tb_req)
    if steps == 1 and B128 >= 256:
        steps = 2                 # give v7x's second TensorCore work
    elif steps > 2 and steps % 2 == 1:
        steps += 1                # even step count splits evenly across 2 cores
    tb = _round_up(_cdiv(B128, steps), 128)
    return tb, steps * tb


def _choose_chunking(tb):
    """Lanes per stream and number of interleaved streams inside one grid step."""
    if tb % 512 == 0:
        return 256, 2             # two interleaved 256-lane chains
    if tb % 256 == 0:
        return 128, 2
    return 128, 1


# ---------------------------------------------------------------------------
# Entry points
# ---------------------------------------------------------------------------
def meta_embedding_padded(x_t, params, *, tb):
    """Zero-copy core on the transposed layout.

    x_t: (F, B_pad) float32, batch on the lane axis, padded rows/columns zero.
    Returns (F, B_pad) float32 (rows z_dim.. are zero).  Callers that can keep
    this layout end-to-end avoid the wrapper's pad/transpose HBM passes.
    """
    L, F, _ = params.wslab.shape
    F_x, B_pad = x_t.shape
    assert F_x == F and tb % 128 == 0 and B_pad % tb == 0
    z_pad = params.dims[-1][1]
    chunk, streams = _choose_chunking(tb)

    kernel = functools.partial(_meta_embedding_kernel, dims=params.dims,
                               z_pad=z_pad, chunk=chunk, streams=streams)
    return pl.pallas_call(
        kernel,
        out_shape=jax.ShapeDtypeStruct((F, B_pad), jnp.float32),
        grid=(B_pad // tb,),
        in_specs=[
            pl.BlockSpec((F, tb), lambda i: (0, i)),        # activations
            pl.BlockSpec((L, F, F), lambda i: (0, 0, 0)),   # resident weight slab
            pl.BlockSpec((L, F, 1), lambda i: (0, 0, 0)),   # resident bias slab
        ],
        out_specs=pl.BlockSpec((F, tb), lambda i: (0, i)),
        compiler_params=pltpu.CompilerParams(
            dimension_semantics=("parallel",)),
    )(x_t, params.wslab, params.bslab)


def meta_embedding(meta_v, params, *, tb=2048):
    """PyTorch-parity API: meta_v (B, meta_dim) -> (B, z_dim) float32."""
    B, meta_dim = meta_v.shape
    assert meta_dim == params.meta_dim
    F = params.wslab.shape[1]
    tb, B_pad = _choose_batch_tiling(B, tb)
    # Layout plumbing (one extra HBM pass each way).  Fuse away by using
    # meta_embedding_padded directly when the caller can keep (F, B) layout.
    x_t = jnp.pad(jnp.asarray(meta_v, jnp.float32).T,
                  ((0, F - meta_dim), (0, B_pad - B)))
    out_t = meta_embedding_padded(x_t, params, tb=tb)
    return out_t[:params.z_dim, :B].T.reshape(-1, params.z_dim)


# ---------------------------------------------------------------------------
# Pure-JAX reference (same layer ordering; optional bf16 matmul operands)
# ---------------------------------------------------------------------------
def meta_embedding_reference(meta_v, weights, biases, z_dim,
                             compute_dtype=jnp.float32):
    def linear(h, i):
        y = jnp.dot(h.astype(compute_dtype), weights[i].astype(compute_dtype),
                    preferred_element_type=jnp.float32)
        return y + jnp.asarray(biases[i], jnp.float32)

    relu = lambda h: jnp.maximum(h, 0.0)
    add = lambda a, b: a + b
    h = _forward_chain(jnp.asarray(meta_v, jnp.float32), linear, relu, add)
    return h.reshape(-1, z_dim)


if __name__ == "__main__":
    meta_dim, z_dim, B = 8, 32, 16

    key = jax.random.PRNGKey(0)
    dims = _layer_dims(meta_dim, z_dim)
    weights, biases = [], []
    for fan_in, fan_out in dims:
        key, kw, kb = jax.random.split(key, 3)
        # Weight init matches init_layers(): uniform(-1/(2*sqrt(fan_in)), +...)
        bound_w = 1.0 / (2.0 * math.sqrt(fan_in))
        weights.append(
            jax.random.uniform(kw, (fan_in, fan_out), jnp.float32, -bound_w, bound_w))
        # Bias keeps the PyTorch nn.Linear default: uniform(-1/sqrt(fan_in), +...)
        bound_b = 1.0 / math.sqrt(fan_in)
        biases.append(
            jax.random.uniform(kb, (1, fan_out), jnp.float32, -bound_b, bound_b))

    key, kx = jax.random.split(key)
    meta_v = jax.random.normal(kx, (B, meta_dim), jnp.float32)

    # ---- default (bf16 MXU operands, f32 accumulation / elementwise) ----
    params_bf16 = pack_params(weights, biases, meta_dim, z_dim)   # bf16 default
    z = jax.block_until_ready(meta_embedding(meta_v, params_bf16))
    z_ref_bf16 = meta_embedding_reference(meta_v, weights, biases, z_dim,
                                          compute_dtype=jnp.bfloat16)
    assert z.shape == (B, z_dim)
    assert z.dtype == jnp.float32
    assert jnp.allclose(z, z_ref_bf16, atol=2e-2, rtol=2e-2), "bf16 path mismatch"

    # ---- f32 matmul path (tight check against the f32 reference) ----
    params_f32 = pack_params(weights, biases, meta_dim, z_dim,
                             compute_dtype=jnp.float32)
    z32 = jax.block_until_ready(meta_embedding(meta_v, params_f32))
    z_ref_f32 = meta_embedding_reference(meta_v, weights, biases, z_dim)
    assert jnp.allclose(z32, z_ref_f32, atol=1e-4, rtol=1e-4), "f32 path mismatch"

    # ---- larger batch: exercises 2 grid steps + 2-stream interleave + padding ----
    key, kx2 = jax.random.split(key)
    meta_v2 = jax.random.normal(kx2, (900, meta_dim), jnp.float32)
    z2 = jax.block_until_ready(meta_embedding(meta_v2, params_bf16, tb=512))
    z2_ref = meta_embedding_reference(meta_v2, weights, biases, z_dim,
                                      compute_dtype=jnp.bfloat16)
    assert z2.shape == (900, z_dim)
    assert jnp.allclose(z2, z2_ref, atol=2e-2, rtol=2e-2), "large-batch mismatch"

    print("KERNEL_OK")
</pallas_src>

<mosaic_0001>
module attributes {stable_mosaic.version = 11 : i64} {
  func.func @_meta_embedding_kernel(%arg0: i32, %arg1: memref<32x128xf32, #tpu.memory_space<vmem>>, %arg2: memref<15x32x32xbf16, #tpu.memory_space<vmem>>, %arg3: memref<15x32x1xf32, #tpu.memory_space<vmem>>, %arg4: memref<32x128xf32, #tpu.memory_space<vmem>>) attributes {dimension_semantics = [#tpu.dimension_semantics<parallel>], iteration_bounds = array<i64: 1>, scalar_prefetch = 0 : i64, scratch_operands = 0 : i64, tpu.core_type = #tpu.core_type<tc>, window_params = [{transform_indices = @transform_0, window_bounds = array<i64: 32, 128>}, {pipeline_mode = #tpu.pipeline_mode<synchronous>, transform_indices = @transform_1, window_bounds = array<i64: 15, 32, 32>}, {pipeline_mode = #tpu.pipeline_mode<synchronous>, transform_indices = @transform_2, window_bounds = array<i64: 15, 32, 1>}, {transform_indices = @transform_3, window_bounds = array<i64: 32, 128>}]} {
    %c0 = arith.constant 0 : index
    %c0_0 = arith.constant 0 : index
    %0 = vector.load %arg1[%c0, %c0_0] : memref<32x128xf32, #tpu.memory_space<vmem>>, vector<8x128xf32>
    %c0_1 = arith.constant 0 : index
    %c0_2 = arith.constant 0 : index
    %c0_3 = arith.constant 0 : index
    %1 = vector.load %arg2[%c0_1, %c0_2, %c0_3] : memref<15x32x32xbf16, #tpu.memory_space<vmem>>, vector<1x8x8xbf16>
    %2 = vector.shape_cast %1 : vector<1x8x8xbf16> to vector<8x8xbf16>
    %c0_4 = arith.constant 0 : index
    %c0_5 = arith.constant 0 : index
    %c0_6 = arith.constant 0 : index
    %3 = vector.load %arg3[%c0_4, %c0_5, %c0_6] : memref<15x32x1xf32, #tpu.memory_space<vmem>>, vector<1x8x1xf32>
    %4 = vector.shape_cast %3 : vector<1x8x1xf32> to vector<8x1xf32>
    %5 = arith.truncf %0 : vector<8x128xf32> to vector<8x128xbf16>
    %cst = arith.constant dense<0.000000e+00> : vector<8x128xf32>
    %6 = tpu.matmul %2, %5, %cst {dimension_numbers = #tpu.dot_dimension_numbers<[1], [0], [0], [1], [0, 0, 1, 1], [], []>} : vector<8x8xbf16>, vector<8x128xbf16>, vector<8x128xf32> -> vector<8x128xf32>
    %7 = vector.broadcast %4 : vector<8x1xf32> to vector<8x128xf32>
    %8 = arith.addf %6, %7 : vector<8x128xf32>
    %cst_7 = arith.constant 0.000000e+00 : f32
    %9 = vector.broadcast %cst_7 : f32 to vector<8x128xf32>
    %10 = arith.maximumf %8, %9 : vector<8x128xf32>
    %c1 = arith.constant 1 : index
    %c0_8 = arith.constant 0 : index
    %c0_9 = arith.constant 0 : index
    %11 = vector.load %arg2[%c1, %c0_8, %c0_9] : memref<15x32x32xbf16, #tpu.memory_space<vmem>>, vector<1x8x8xbf16>
    %12 = vector.shape_cast %11 : vector<1x8x8xbf16> to vector<8x8xbf16>
    %c1_10 = arith.constant 1 : index
    %c0_11 = arith.constant 0 : index
    %c0_12 = arith.constant 0 : index
    %13 = vector.load %arg3[%c1_10, %c0_11, %c0_12] : memref<15x32x1xf32, #tpu.memory_space<vmem>>, vector<1x8x1xf32>
    %14 = vector.shape_cast %13 : vector<1x8x1xf32> to vector<8x1xf32>
    %15 = arith.truncf %10 : vector<8x128xf32> to vector<8x128xbf16>
    %cst_13 = arith.constant dense<0.000000e+00> : vector<8x128xf32>
    %16 = tpu.matmul %12, %15, %cst_13 {dimension_numbers = #tpu.dot_dimension_numbers<[1], [0], [0], [1], [0, 0, 1, 1], [], []>} : vector<8x8xbf16>, vector<8x128xbf16>, vector<8x128xf32> -> vector<8x128xf32>
    %17 = vector.broadcast %14 : vector<8x1xf32> to vector<8x128xf32>
    %18 = arith.addf %16, %17 : vector<8x128xf32>
    %cst_14 = arith.constant 0.000000e+00 : f32
    %19 = vector.broadcast %cst_14 : f32 to vector<8x128xf32>
    %20 = arith.maximumf %18, %19 : vector<8x128xf32>
    %c2 = arith.constant 2 : index
    %c0_15 = arith.constant 0 : index
    %c0_16 = arith.constant 0 : index
    %21 = vector.load %arg2[%c2, %c0_15, %c0_16] : memref<15x32x32xbf16, #tpu.memory_space<vmem>>, vector<1x8x8xbf16>
    %22 = vector.shape_cast %21 : vector<1x8x8xbf16> to vector<8x8xbf16>
    %c2_17 = arith.constant 2 : index
    %c0_18 = arith.constant 0 : index
    %c0_19 = arith.constant 0 : index
    %23 = vector.load %arg3[%c2_17, %c0_18, %c0_19] : memref<15x32x1xf32, #tpu.memory_space<vmem>>, vector<1x8x1xf32>
    %24 = vector.shape_cast %23 : vector<1x8x1xf32> to vector<8x1xf32>
    %25 = arith.truncf %20 : vector<8x128xf32> to vector<8x128xbf16>
    %cst_20 = arith.constant dense<0.000000e+00> : vector<8x128xf32>
    %26 = tpu.matmul %22, %25, %cst_20 {dimension_numbers = #tpu.dot_dimension_numbers<[1], [0], [0], [1], [0, 0, 1, 1], [], []>} : vector<8x8xbf16>, vector<8x128xbf16>, vector<8x128xf32> -> vector<8x128xf32>
    %27 = vector.broadcast %24 : vector<8x1xf32> to vector<8x128xf32>
    %28 = arith.addf %26, %27 : vector<8x128xf32>
    %29 = arith.addf %8, %28 : vector<8x128xf32>
    %cst_21 = arith.constant 0.000000e+00 : f32
    %30 = vector.broadcast %cst_21 : f32 to vector<8x128xf32>
    %31 = arith.maximumf %29, %30 : vector<8x128xf32>
    %c3 = arith.constant 3 : index
    %c0_22 = arith.constant 0 : index
    %c0_23 = arith.constant 0 : index
    %32 = vector.load %arg2[%c3, %c0_22, %c0_23] : memref<15x32x32xbf16, #tpu.memory_space<vmem>>, vector<1x8x8xbf16>
    %33 = vector.shape_cast %32 : vector<1x8x8xbf16> to vector<8x8xbf16>
    %c3_24 = arith.constant 3 : index
    %c0_25 = arith.constant 0 : index
    %c0_26 = arith.constant 0 : index
    %34 = vector.load %arg3[%c3_24, %c0_25, %c0_26] : memref<15x32x1xf32, #tpu.memory_space<vmem>>, vector<1x8x1xf32>
    %35 = vector.shape_cast %34 : vector<1x8x1xf32> to vector<8x1xf32>
    %36 = arith.truncf %31 : vector<8x128xf32> to vector<8x128xbf16>
    %cst_27 = arith.constant dense<0.000000e+00> : vector<8x128xf32>
    %37 = tpu.matmul %33, %36, %cst_27 {dimension_numbers = #tpu.dot_dimension_numbers<[1], [0], [0], [1], [0, 0, 1, 1], [], []>} : vector<8x8xbf16>, vector<8x128xbf16>, vector<8x128xf32> -> vector<8x128xf32>
    %38 = vector.broadcast %35 : vector<8x1xf32> to vector<8x128xf32>
    %39 = arith.addf %37, %38 : vector<8x128xf32>
    %cst_28 = arith.constant 0.000000e+00 : f32
    %40 = vector.broadcast %cst_28 : f32 to vector<8x128xf32>
    %41 = arith.maximumf %39, %40 : vector<8x128xf32>
    %c4 = arith.constant 4 : index
    %c0_29 = arith.constant 0 : index
    %c0_30 = arith.constant 0 : index
    %42 = vector.load %arg2[%c4, %c0_29, %c0_30] : memref<15x32x32xbf16, #tpu.memory_space<vmem>>, vector<1x8x8xbf16>
    %43 = vector.shape_cast %42 : vector<1x8x8xbf16> to vector<8x8xbf16>
    %c4_31 = arith.constant 4 : index
    %c0_32 = arith.constant 0 : index
    %c0_33 = arith.constant 0 : index
    %44 = vector.load %arg3[%c4_31, %c0_32, %c0_33] : memref<15x32x1xf32, #tpu.memory_space<vmem>>, vector<1x8x1xf32>
    %45 = vector.shape_cast %44 : vector<1x8x1xf32> to vector<8x1xf32>
    %46 = arith.truncf %41 : vector<8x128xf32> to vector<8x128xbf16>
    %cst_34 = arith.constant dense<0.000000e+00> : vector<8x128xf32>
    %47 = tpu.matmul %43, %46, %cst_34 {dimension_numbers = #tpu.dot_dimension_numbers<[1], [0], [0], [1], [0, 0, 1, 1], [], []>} : vector<8x8xbf16>, vector<8x128xbf16>, vector<8x128xf32> -> vector<8x128xf32>
    %48 = vector.broadcast %45 : vector<8x1xf32> to vector<8x128xf32>
    %49 = arith.addf %47, %48 : vector<8x128xf32>
    %50 = arith.addf %29, %49 : vector<8x128xf32>
    %c5 = arith.constant 5 : index
    %c0_35 = arith.constant 0 : index
    %c0_36 = arith.constant 0 : index
    %51 = vector.load %arg2[%c5, %c0_35, %c0_36] : memref<15x32x32xbf16, #tpu.memory_space<vmem>>, vector<1x16x8xbf16>
    %52 = vector.shape_cast %51 : vector<1x16x8xbf16> to vector<16x8xbf16>
    %c5_37 = arith.constant 5 : index
    %c0_38 = arith.constant 0 : index
    %c0_39 = arith.constant 0 : index
    %53 = vector.load %arg3[%c5_37, %c0_38, %c0_39] : memref<15x32x1xf32, #tpu.memory_space<vmem>>, vector<1x16x1xf32>
    %54 = vector.shape_cast %53 : vector<1x16x1xf32> to vector<16x1xf32>
    %55 = arith.truncf %50 : vector<8x128xf32> to vector<8x128xbf16>
    %cst_40 = arith.constant dense<0.000000e+00> : vector<16x128xf32>
    %56 = tpu.matmul %52, %55, %cst_40 {dimension_numbers = #tpu.dot_dimension_numbers<[1], [0], [0], [1], [0, 0, 1, 1], [], []>} : vector<16x8xbf16>, vector<8x128xbf16>, vector<16x128xf32> -> vector<16x128xf32>
    %57 = vector.broadcast %54 : vector<16x1xf32> to vector<16x128xf32>
    %58 = arith.addf %56, %57 : vector<16x128xf32>
    %cst_41 = arith.constant 0.000000e+00 : f32
    %59 = vector.broadcast %cst_41 : f32 to vector<16x128xf32>
    %60 = arith.maximumf %58, %59 : vector<16x128xf32>
    %c6 = arith.constant 6 : index
    %c0_42 = arith.constant 0 : index
    %c0_43 = arith.constant 0 : index
    %61 = vector.load %arg2[%c6, %c0_42, %c0_43] : memref<15x32x32xbf16, #tpu.memory_space<vmem>>, vector<1x16x16xbf16>
    %62 = vector.shape_cast %61 : vector<1x16x16xbf16> to vector<16x16xbf16>
    %c6_44 = arith.constant 6 : index
    %c0_45 = arith.constant 0 : index
    %c0_46 = arith.constant 0 : index
    %63 = vector.load %arg3[%c6_44, %c0_45, %c0_46] : memref<15x32x1xf32, #tpu.memory_space<vmem>>, vector<1x16x1xf32>
    %64 = vector.shape_cast %63 : vector<1x16x1xf32> to vector<16x1xf32>
    %65 = arith.truncf %60 : vector<16x128xf32> to vector<16x128xbf16>
    %cst_47 = arith.constant dense<0.000000e+00> : vector<16x128xf32>
    %66 = tpu.matmul %62, %65, %cst_47 {dimension_numbers = #tpu.dot_dimension_numbers<[1], [0], [0], [1], [0, 0, 1, 1], [], []>} : vector<16x16xbf16>, vector<16x128xbf16>, vector<16x128xf32> -> vector<16x128xf32>
    %67 = vector.broadcast %64 : vector<16x1xf32> to vector<16x128xf32>
    %68 = arith.addf %66, %67 : vector<16x128xf32>
    %cst_48 = arith.constant 0.000000e+00 : f32
    %69 = vector.broadcast %cst_48 : f32 to vector<16x128xf32>
    %70 = arith.maximumf %68, %69 : vector<16x128xf32>
    %c7 = arith.constant 7 : index
    %c0_49 = arith.constant 0 : index
    %c0_50 = arith.constant 0 : index
    %71 = vector.load %arg2[%c7, %c0_49, %c0_50] : memref<15x32x32xbf16, #tpu.memory_space<vmem>>, vector<1x16x16xbf16>
    %72 = vector.shape_cast %71 : vector<1x16x16xbf16> to vector<16x16xbf16>
    %c7_51 = arith.constant 7 : index
    %c0_52 = arith.constant 0 : index
    %c0_53 = arith.constant 0 : index
    %73 = vector.load %arg3[%c7_51, %c0_52, %c0_53] : memref<15x32x1xf32, #tpu.memory_space<vmem>>, vector<1x16x1xf32>
    %74 = vector.shape_cast %73 : vector<1x16x1xf32> to vector<16x1xf32>
    %75 = arith.truncf %70 : vector<16x128xf32> to vector<16x128xbf16>
    %cst_54 = arith.constant dense<0.000000e+00> : vector<16x128xf32>
    %76 = tpu.matmul %72, %75, %cst_54 {dimension_numbers = #tpu.dot_dimension_numbers<[1], [0], [0], [1], [0, 0, 1, 1], [], []>} : vector<16x16xbf16>, vector<16x128xbf16>, vector<16x128xf32> -> vector<16x128xf32>
    %77 = vector.broadcast %74 : vector<16x1xf32> to vector<16x128xf32>
    %78 = arith.addf %76, %77 : vector<16x128xf32>
    %79 = arith.addf %58, %78 : vector<16x128xf32>
    %cst_55 = arith.constant 0.000000e+00 : f32
    %80 = vector.broadcast %cst_55 : f32 to vector<16x128xf32>
    %81 = arith.maximumf %79, %80 : vector<16x128xf32>
    %c8 = arith.constant 8 : index
    %c0_56 = arith.constant 0 : index
    %c0_57 = arith.constant 0 : index
    %82 = vector.load %arg2[%c8, %c0_56, %c0_57] : memref<15x32x32xbf16, #tpu.memory_space<vmem>>, vector<1x16x16xbf16>
    %83 = vector.shape_cast %82 : vector<1x16x16xbf16> to vector<16x16xbf16>
    %c8_58 = arith.constant 8 : index
    %c0_59 = arith.constant 0 : index
    %c0_60 = arith.constant 0 : index
    %84 = vector.load %arg3[%c8_58, %c0_59, %c0_60] : memref<15x32x1xf32, #tpu.memory_space<vmem>>, vector<1x16x1xf32>
    %85 = vector.shape_cast %84 : vector<1x16x1xf32> to vector<16x1xf32>
    %86 = arith.truncf %81 : vector<16x128xf32> to vector<16x128xbf16>
    %cst_61 = arith.constant dense<0.000000e+00> : vector<16x128xf32>
    %87 = tpu.matmul %83, %86, %cst_61 {dimension_numbers = #tpu.dot_dimension_numbers<[1], [0], [0], [1], [0, 0, 1, 1], [], []>} : vector<16x16xbf16>, vector<16x128xbf16>, vector<16x128xf32> -> vector<16x128xf32>
    %88 = vector.broadcast %85 : vector<16x1xf32> to vector<16x128xf32>
    %89 = arith.addf %87, %88 : vector<16x128xf32>
    %cst_62 = arith.constant 0.000000e+00 : f32
    %90 = vector.broadcast %cst_62 : f32 to vector<16x128xf32>
    %91 = arith.maximumf %89, %90 : vector<16x128xf32>
    %c9 = arith.constant 9 : index
    %c0_63 = arith.constant 0 : index
    %c0_64 = arith.constant 0 : index
    %92 = vector.load %arg2[%c9, %c0_63, %c0_64] : memref<15x32x32xbf16, #tpu.memory_space<vmem>>, vector<1x16x16xbf16>
    %93 = vector.shape_cast %92 : vector<1x16x16xbf16> to vector<16x16xbf16>
    %c9_65 = arith.constant 9 : index
    %c0_66 = arith.constant 0 : index
    %c0_67 = arith.constant 0 : index
    %94 = vector.load %arg3[%c9_65, %c0_66, %c0_67] : memref<15x32x1xf32, #tpu.memory_space<vmem>>, vector<1x16x1xf32>
    %95 = vector.shape_cast %94 : vector<1x16x1xf32> to vector<16x1xf32>
    %96 = arith.truncf %91 : vector<16x128xf32> to vector<16x128xbf16>
    %cst_68 = arith.constant dense<0.000000e+00> : vector<16x128xf32>
    %97 = tpu.matmul %93, %96, %cst_68 {dimension_numbers = #tpu.dot_dimension_numbers<[1], [0], [0], [1], [0, 0, 1, 1], [], []>} : vector<16x16xbf16>, vector<16x128xbf16>, vector<16x128xf32> -> vector<16x128xf32>
    %98 = vector.broadcast %95 : vector<16x1xf32> to vector<16x128xf32>
    %99 = arith.addf %97, %98 : vector<16x128xf32>
    %100 = arith.addf %79, %99 : vector<16x128xf32>
    %c10 = arith.constant 10 : index
    %c0_69 = arith.constant 0 : index
    %c0_70 = arith.constant 0 : index
    %101 = vector.load %arg2[%c10, %c0_69, %c0_70] : memref<15x32x32xbf16, #tpu.memory_space<vmem>>, vector<1x32x16xbf16>
    %102 = vector.shape_cast %101 : vector<1x32x16xbf16> to vector<32x16xbf16>
    %c10_71 = arith.constant 10 : index
    %c0_72 = arith.constant 0 : index
    %c0_73 = arith.constant 0 : index
    %103 = vector.load %arg3[%c10_71, %c0_72, %c0_73] : memref<15x32x1xf32, #tpu.memory_space<vmem>>, vector<1x32x1xf32>
    %104 = vector.shape_cast %103 : vector<1x32x1xf32> to vector<32x1xf32>
    %105 = arith.truncf %100 : vector<16x128xf32> to vector<16x128xbf16>
    %cst_74 = arith.constant dense<0.000000e+00> : vector<32x128xf32>
    %106 = tpu.matmul %102, %105, %cst_74 {dimension_numbers = #tpu.dot_dimension_numbers<[1], [0], [0], [1], [0, 0, 1, 1], [], []>} : vector<32x16xbf16>, vector<16x128xbf16>, vector<32x128xf32> -> vector<32x128xf32>
    %107 = vector.broadcast %104 : vector<32x1xf32> to vector<32x128xf32>
    %108 = arith.addf %106, %107 : vector<32x128xf32>
    %cst_75 = arith.constant 0.000000e+00 : f32
    %109 = vector.broadcast %cst_75 : f32 to vector<32x128xf32>
    %110 = arith.maximumf %108, %109 : vector<32x128xf32>
    %c11 = arith.constant 11 : index
    %c0_76 = arith.constant 0 : index
    %c0_77 = arith.constant 0 : index
    %111 = vector.load %arg2[%c11, %c0_76, %c0_77] : memref<15x32x32xbf16, #tpu.memory_space<vmem>>, vector<1x32x32xbf16>
    %112 = vector.shape_cast %111 : vector<1x32x32xbf16> to vector<32x32xbf16>
    %c11_78 = arith.constant 11 : index
    %c0_79 = arith.constant 0 : index
    %c0_80 = arith.constant 0 : index
    %113 = vector.load %arg3[%c11_78, %c0_79, %c0_80] : memref<15x32x1xf32, #tpu.memory_space<vmem>>, vector<1x32x1xf32>
    %114 = vector.shape_cast %113 : vector<1x32x1xf32> to vector<32x1xf32>
    %115 = arith.truncf %110 : vector<32x128xf32> to vector<32x128xbf16>
    %cst_81 = arith.constant dense<0.000000e+00> : vector<32x128xf32>
    %116 = tpu.matmul %112, %115, %cst_81 {dimension_numbers = #tpu.dot_dimension_numbers<[1], [0], [0], [1], [0, 0, 1, 1], [], []>} : vector<32x32xbf16>, vector<32x128xbf16>, vector<32x128xf32> -> vector<32x128xf32>
    %117 = vector.broadcast %114 : vector<32x1xf32> to vector<32x128xf32>
    %118 = arith.addf %116, %117 : vector<32x128xf32>
    %cst_82 = arith.constant 0.000000e+00 : f32
    %119 = vector.broadcast %cst_82 : f32 to vector<32x128xf32>
    %120 = arith.maximumf %118, %119 : vector<32x128xf32>
    %c12 = arith.constant 12 : index
    %c0_83 = arith.constant 0 : index
    %c0_84 = arith.constant 0 : index
    %121 = vector.load %arg2[%c12, %c0_83, %c0_84] : memref<15x32x32xbf16, #tpu.memory_space<vmem>>, vector<1x32x32xbf16>
    %122 = vector.shape_cast %121 : vector<1x32x32xbf16> to vector<32x32xbf16>
    %c12_85 = arith.constant 12 : index
    %c0_86 = arith.constant 0 : index
    %c0_87 = arith.constant 0 : index
    %123 = vector.load %arg3[%c12_85, %c0_86, %c0_87] : memref<15x32x1xf32, #tpu.memory_space<vmem>>, vector<1x32x1xf32>
    %124 = vector.shape_cast %123 : vector<1x32x1xf32> to vector<32x1xf32>
    %125 = arith.truncf %120 : vector<32x128xf32> to vector<32x128xbf16>
    %cst_88 = arith.constant dense<0.000000e+00> : vector<32x128xf32>
    %126 = tpu.matmul %122, %125, %cst_88 {dimension_numbers = #tpu.dot_dimension_numbers<[1], [0], [0], [1], [0, 0, 1, 1], [], []>} : vector<32x32xbf16>, vector<32x128xbf16>, vector<32x128xf32> -> vector<32x128xf32>
    %127 = vector.broadcast %124 : vector<32x1xf32> to vector<32x128xf32>
    %128 = arith.addf %126, %127 : vector<32x128xf32>
    %129 = arith.addf %108, %128 : vector<32x128xf32>
    %cst_89 = arith.constant 0.000000e+00 : f32
    %130 = vector.broadcast %cst_89 : f32 to vector<32x128xf32>
    %131 = arith.maximumf %129, %130 : vector<32x128xf32>
    %c13 = arith.constant 13 : index
    %c0_90 = arith.constant 0 : index
    %c0_91 = arith.constant 0 : index
    %132 = vector.load %arg2[%c13, %c0_90, %c0_91] : memref<15x32x32xbf16, #tpu.memory_space<vmem>>, vector<1x32x32xbf16>
    %133 = vector.shape_cast %132 : vector<1x32x32xbf16> to vector<32x32xbf16>
    %c13_92 = arith.constant 13 : index
    %c0_93 = arith.constant 0 : index
    %c0_94 = arith.constant 0 : index
    %134 = vector.load %arg3[%c13_92, %c0_93, %c0_94] : memref<15x32x1xf32, #tpu.memory_space<vmem>>, vector<1x32x1xf32>
    %135 = vector.shape_cast %134 : vector<1x32x1xf32> to vector<32x1xf32>
    %136 = arith.truncf %131 : vector<32x128xf32> to vector<32x128xbf16>
    %cst_95 = arith.constant dense<0.000000e+00> : vector<32x128xf32>
    %137 = tpu.matmul %133, %136, %cst_95 {dimension_numbers = #tpu.dot_dimension_numbers<[1], [0], [0], [1], [0, 0, 1, 1], [], []>} : vector<32x32xbf16>, vector<32x128xbf16>, vector<32x128xf32> -> vector<32x128xf32>
    %138 = vector.broadcast %135 : vector<32x1xf32> to vector<32x128xf32>
    %139 = arith.addf %137, %138 : vector<32x128xf32>
    %cst_96 = arith.constant 0.000000e+00 : f32
    %140 = vector.broadcast %cst_96 : f32 to vector<32x128xf32>
    %141 = arith.maximumf %139, %140 : vector<32x128xf32>
    %c14 = arith.constant 14 : index
    %c0_97 = arith.constant 0 : index
    %c0_98 = arith.constant 0 : index
    %142 = vector.load %arg2[%c14, %c0_97, %c0_98] : memref<15x32x32xbf16, #tpu.memory_space<vmem>>, vector<1x32x32xbf16>
    %143 = vector.shape_cast %142 : vector<1x32x32xbf16> to vector<32x32xbf16>
    %c14_99 = arith.constant 14 : index
    %c0_100 = arith.constant 0 : index
    %c0_101 = arith.constant 0 : index
    %144 = vector.load %arg3[%c14_99, %c0_100, %c0_101] : memref<15x32x1xf32, #tpu.memory_space<vmem>>, vector<1x32x1xf32>
    %145 = vector.shape_cast %144 : vector<1x32x1xf32> to vector<32x1xf32>
    %146 = arith.truncf %141 : vector<32x128xf32> to vector<32x128xbf16>
    %cst_102 = arith.constant dense<0.000000e+00> : vector<32x128xf32>
    %147 = tpu.matmul %143, %146, %cst_102 {dimension_numbers = #tpu.dot_dimension_numbers<[1], [0], [0], [1], [0, 0, 1, 1], [], []>} : vector<32x32xbf16>, vector<32x128xbf16>, vector<32x128xf32> -> vector<32x128xf32>
    %148 = vector.broadcast %145 : vector<32x1xf32> to vector<32x128xf32>
    %149 = arith.addf %147, %148 : vector<32x128xf32>
    %150 = arith.addf %129, %149 : vector<32x128xf32>
    %c0_103 = arith.constant 0 : index
    %c0_104 = arith.constant 0 : index
    %151 = vector.load %arg4[%c0_103, %c0_104] : memref<32x128xf32, #tpu.memory_space<vmem>>, vector<32x128xf32>
    tpu.vector_store %arg4[%c0_103, %c0_104], %150 {strides = array<i32>} : memref<32x128xf32, #tpu.memory_space<vmem>>, vector<32x128xf32>,
    return
  }
  func.func @transform_0(%arg0: i32) -> (i32, i32) {
    %c0_i32 = arith.constant 0 : i32
    %c0_i32_0 = arith.constant 0 : i32
    return %c0_i32, %arg0 : i32, i32
  }
  func.func @transform_1(%arg0: i32) -> (i32, i32, i32) {
    %c0_i32 = arith.constant 0 : i32
    %c0_i32_0 = arith.constant 0 : i32
    %c0_i32_1 = arith.constant 0 : i32
    %c0_i32_2 = arith.constant 0 : i32
    return %c0_i32, %c0_i32_0, %c0_i32_1 : i32, i32, i32
  }
  func.func @transform_2(%arg0: i32) -> (i32, i32, i32) {
    %c0_i32 = arith.constant 0 : i32
    %c0_i32_0 = arith.constant 0 : i32
    %c0_i32_1 = arith.constant 0 : i32
    %c0_i32_2 = arith.constant 0 : i32
    return %c0_i32, %c0_i32_0, %c0_i32_1 : i32, i32, i32
  }
  func.func @transform_3(%arg0: i32) -> (i32, i32) {
    %c0_i32 = arith.constant 0 : i32
    %c0_i32_0 = arith.constant 0 : i32
    return %c0_i32, %arg0 : i32, i32
  }
}

</mosaic_0001>

<bundles_post_ra>
// kernel: tpu_custom_call.1
= control target key start
LH: loop header
LB: loop body
LE: loop exit
PB: predicated region body
PF: predicated region fallthrough
CT: control target
= control target key end

     0   :  { %vm29_vm0 = vcmask 1043456   ;;  %v1465_v1 = vmov 0.0   ;;  %vm1466_vm1 = vmmov 0   ;;  %v1467_v4 = vmov 0   ;;  %s1731_s0 = inlined_call_operand.vmem [shape: f32[32,128], index: 0, kind: input, shape index: {}]   ;;  %s1732_s1 = inlined_call_operand.vmem [shape: bf16[15,32,32], index: 1, kind: input, shape index: {}]   ;;  %s1733_s2 = inlined_call_operand.vmem [shape: f32[15,32,1], index: 2, kind: input, shape index: {}]   ;;  %s1734_s3 = inlined_call_operand.hbm [shape: f32[32,128], index: 3, kind: output, shape index: {}]  }
   0x1   :  { %v16_v0 = vld [vmem:[%s1731_s0] sm:$0xff]  ;;  %1320 = vmatprep.subr.bf16.mxu0 %v1465_v1  ;;  %1322 = vmatprep.mubr.msk.bf16.mxu0 %vm1466_vm1, %v1465_v1  ;;  %vm25_vm2 = vcmask 64512   ;;  %v1194_v9 = vld [vmem:[%s1733_s2 + $0xa8] sm:$0xff] }
   0x2   :  { %v19_v2 = vpack.c.bf16 %v16_v0, %v16_v0  ;;  %v18_v3 = vld [vmem:[%s1733_s2] sm:$0xff]  ;;  %1424 = vset.pattern.permute.xlu0 %v1467_v4  ;;  %1326 = vmatprep.subr.bf16.mxu1 %v1465_v1  ;;  %v1200_v10 = vld [vmem:[%s1733_s2 + $0xc8] sm:$0xff] }
   0x3   :  { %22 = vperm.xlu0 %1424, %v18_v3   ;;  %1328 = vmatprep.mubr.msk.bf16.mxu1 %vm1466_vm1, %v1465_v1  ;;  %v17_v6 = vld [vmem:[%s1732_s1] sm:$0xf] }
   0x4   :  { %v31_v5 = vsel %vm29_vm0, %v19_v2, 0  ;;  %v1180_v7 = vld [vmem:[%s1733_s2 + $0x20] sm:$0xff]  ;;  %1425 = vset.pattern.permute.xlu1 %v1467_v4 }
   0x5   :  { %1321 = vmatpush3.bf16.msra.mxu0 %v31_v5  ;;  %v1189_v8 = vld [vmem:[%s1733_s2 + $0x80] sm:$0xff] }
   0x6   :  { %1332 = vmatprep.subr.bf16.mxu0 %v1465_v1 }
   0x7   :  { %81 = vperm.xlu0 %1424, %v1180_v7  }
   0x8   :  { %1323 = vmatmul.mubr.msk.bf16.vlgmr.msra.gmra.mrb[0].mxu0 %vm25_vm2, %v17_v6 }
   0x9   :  { %1334 = vmatprep.mubr.msk.bf16.mxu0 %vm1466_vm1, %v1465_v1 }
   0xb   :  { %253 = vperm.xlu0 %1424, %v1189_v8  }
   0xf   :  { %317 = vperm.xlu0 %1424, %v1194_v9  }
  0x10   :  { %8 = vsyncpa [#allocation3], 0  ;;  %v1206_v11 = vld [vmem:[%s1733_s2 + $0xe8] sm:$0xff]  ;;  %v1228_v15 = vld [vmem:[%s1733_s2 + $0x158] sm:$0xff]  ;;  %vm396_vm3 = vcmask 130048   ;;  %vm791_vm4 = vcmask 261120  }
  0x11   :  { %v1212_v12 = vld [vmem:[%s1733_s2 + $0x108] sm:$0xff]  ;;  %v1240_v17 = vld [vmem:[%s1733_s2 + $0x178] sm:$0xff]  ;;  %v1179_v33 = vld [vmem:[%s1732_s1 + $0x10] sm:$0xf]  ;;  %s1468_s10 = smov [#allocation2]  }
  0x12   :  { %v1218_v13 = vld [vmem:[%s1733_s2 + $0x128] sm:$0xff]  ;;  %v1252_v19 = vld [vmem:[%s1733_s2 + $0x198] sm:$0xff]  ;;  %v1183_v34 = vld [vmem:[%s1733_s2 + $0x40] sm:$0xff]  ;;  %s1167_s11 = sshll.u32 %s1468_s10, 4  ;;  %s1168_s11 = int_to_ptr.vmem [resolvable:$true] %s1167_s11 }
  0x13   :  { %388 = vperm.xlu0 %1424, %v1200_v10   ;;  %v1226_v14 = vld [vmem:[%s1733_s2 + $0x148] sm:$0xff]  ;;  %v1264_v21 = vld [vmem:[%s1733_s2 + $0x1b8] sm:$0xff]  ;;  %138 = vperm.xlu1 %1425, %v1183_v34   ;;  %v1186_v35 = vld [vmem:[%s1733_s2 + $0x60] sm:$0xff]  ;;  %p1446_p1 = scmp.lt.s32.totalorder %s1168_s11, %s1168_s11 }
  0x14   :  { %v1238_v16 = vld [vmem:[%s1733_s2 + $0x168] sm:$0xff]  ;;  %v1276_v23 = vld [vmem:[%s1733_s2 + $0x1d8] sm:$0xff]  ;;  %v1193_v36 = vld [vmem:[%s1733_s2 + $0xa0] sm:$0xff] }
  0x15   :  { %v1250_v18 = vld [vmem:[%s1733_s2 + $0x188] sm:$0xff]  ;;  %v1199_v37 = vld [vmem:[%s1733_s2 + $0xc0] sm:$0xff]  ;;  %v1227_v42 = vld [vmem:[%s1733_s2 + $0x150] sm:$0xff] }
  0x16   :  { %v1262_v20 = vld [vmem:[%s1733_s2 + $0x1a8] sm:$0xff]  ;;  %v1205_v38 = vld [vmem:[%s1733_s2 + $0xe0] sm:$0xff]  ;;  %v1239_v44 = vld [vmem:[%s1733_s2 + $0x170] sm:$0xff] }
  0x17   :  { %457 = vperm.xlu0 %1424, %v1206_v11   ;;  %v1274_v22 = vld [vmem:[%s1733_s2 + $0x1c8] sm:$0xff]  ;;  %196 = vperm.xlu1 %1425, %v1186_v35   ;;  %v1211_v39 = vld [vmem:[%s1733_s2 + $0x100] sm:$0xff]  ;;  %v1251_v46 = vld [vmem:[%s1733_s2 + $0x190] sm:$0xff] }
  0x18   :  { %v1217_v40 = vld [vmem:[%s1733_s2 + $0x120] sm:$0xff]  ;;  %v1263_v48 = vld [vmem:[%s1733_s2 + $0x1b0] sm:$0xff] }
  0x19   :  { %v1225_v41 = vld [vmem:[%s1733_s2 + $0x140] sm:$0xff]  ;;  %v1275_v50 = vld [vmem:[%s1733_s2 + $0x1d0] sm:$0xff] }
  0x1a   :  { %v1237_v43 = vld [vmem:[%s1733_s2 + $0x160] sm:$0xff]  ;;  %v1185_v8 = vld [vmem:[%s1732_s1 + $0x30] sm:$0xf] }
  0x1b   :  { %527 = vperm.xlu0 %1424, %v1212_v12   ;;  %312 = vperm.xlu1 %1425, %v1193_v36   ;;  %v1249_v45 = vld [vmem:[%s1733_s2 + $0x180] sm:$0xff] }
  0x1c   :  { %v1261_v47 = vld [vmem:[%s1733_s2 + $0x1a0] sm:$0xff] }
  0x1d   :  { %v1273_v49 = vld [vmem:[%s1733_s2 + $0x1c0] sm:$0xff] }
  0x1e   :  { %v1182_v60 = vld [vmem:[%s1732_s1 + $0x20] sm:$0xf] }
  0x1f   :  { %595 = vperm.xlu0 %1424, %v1218_v13   ;;  %383 = vperm.xlu1 %1425, %v1199_v37  }
  0x23   :  { %667 = vperm.xlu0 %1424, %v1226_v14   ;;  %452 = vperm.xlu1 %1425, %v1205_v38  }
  0x27   :  { %677 = vperm.xlu0 %1424, %v1228_v15   ;;  %522 = vperm.xlu1 %1425, %v1211_v39  }
  0x2b   :  { %768 = vperm.xlu0 %1424, %v1238_v16   ;;  %590 = vperm.xlu1 %1425, %v1217_v40   ;;  %v1427_v40 = vld [vmem:[%s1732_s1 + $0x60] sm:$0xff]  }
  0x2f   :  { %778 = vperm.xlu0 %1424, %v1240_v17   ;;  %662 = vperm.xlu1 %1425, %v1225_v41  }
  0x33   :  { %870 = vperm.xlu0 %1424, %v1250_v18   ;;  %672 = vperm.xlu1 %1425, %v1227_v42   ;;  %v1188_v18 = vld [vmem:[%s1732_s1 + $0x40] sm:$0xf] }
  0x37   :  { %880 = vperm.xlu0 %1424, %v1252_v19   ;;  %763 = vperm.xlu1 %1425, %v1237_v43  }
  0x3b   :  { %975 = vperm.xlu0 %1424, %v1262_v20   ;;  %773 = vperm.xlu1 %1425, %v1239_v44  }
  0x3f   :  { %985 = vperm.xlu0 %1424, %v1264_v21   ;;  %865 = vperm.xlu1 %1425, %v1249_v45  }
  0x43   :  { %1076 = vperm.xlu0 %1424, %v1274_v22   ;;  %875 = vperm.xlu1 %1425, %v1251_v46  }
  0x47   :  { %1086 = vperm.xlu0 %1424, %v1276_v23   ;;  %970 = vperm.xlu1 %1425, %v1261_v47  }
  0x4b   :  { %980 = vperm.xlu1 %1425, %v1263_v48  }
  0x4f   :  { %1071 = vperm.xlu1 %1425, %v1273_v49  }
  0x53   :  { %1081 = vperm.xlu1 %1425, %v1275_v50  }
  0x82   :  { %v23_v24 = vpop.permute.xlu0 %22 }
  0x86   :  { %v82_v51 = vpop.permute.xlu0 %81 }
  0x8a   :  { %v254_v19 = vpop.permute.xlu0 %253 }
  0x92   :  { %v139_v61 = vpop.permute.xlu1 %138 }
  0x96   :  { %v197_v9 = vpop.permute.xlu1 %196 }
  0xdb   :  { %v67_v25 = vpop.f32.mrb[0].mxu0 }
  0xdc   :  { %v1562_v26 = vadd.f32 %v67_v25, %v23_v24  ;;  %v1324_v27 = vpop.f32.mrb[1].mxu0 }
  0xdd   :  { %v70_v28 = vpop.f32.mrb[2].mxu0 }
  0xde   :  { %v73_v29 = vmax.f32 %v1562_v26, 0.0  ;;  %v1325_v30 = vpop.f32.mrb[3].mxu0  ;;  %v1426_v28 = vld [vmem:[%s1732_s1 + $0x50] sm:$0xff]  }
  0xe0   :  { %v78_v31 = vpack.c.bf16 %v73_v29, %v73_v29  ;;  %v313_v29 = vpop.permute.xlu1 %312 }
  0xe2   :  { %v88_v32 = vsel %vm29_vm0, %v78_v31, 0 }
  0xe3   :  { %1327 = vmatpush3.bf16.msra.mxu1 %v88_v32 }
  0xe4   :  { %1338 = vmatprep.subr.bf16.mxu1 %v1465_v1  ;;  %v384_v41 = vpop.permute.xlu1 %383 }
  0xe6   :  { %1329 = vmatmul.mubr.msk.bf16.vlgmr.msra.gmra.mrb[0].mxu1 %vm25_vm2, %v1179_v33  ;;  %v318_v33 = vpop.permute.xlu0 %317 }
  0xe7   :  { %1340 = vmatprep.mubr.msk.bf16.mxu1 %vm1466_vm1, %v1465_v1 }
  0xea   :  { %v389_v45 = vpop.permute.xlu0 %388 }
 0x1b9   :  { %v124_v52 = vpop.f32.mrb[0].mxu1 }
 0x1ba   :  { %v125_v53 = vadd.f32 %v124_v52, %v82_v51  ;;  %v1330_v54 = vpop.f32.mrb[1].mxu1  ;;  %v1428_v52 = vld [vmem:[%s1732_s1 + $0x70] sm:$0xff]  }
 0x1bb   :  { %v127_v55 = vpop.f32.mrb[2].mxu1 }
 0x1bc   :  { %v130_v56 = vmax.f32 %v125_v53, 0.0  ;;  %v1331_v57 = vpop.f32.mrb[3].mxu1  ;;  %v453_v53 = vpop.permute.xlu1 %452 }
 0x1bd   :  { %v458_v57 = vpop.permute.xlu0 %457 }
 0x1be   :  { %v135_v58 = vpack.c.bf16 %v130_v56, %v130_v56 }
 0x1c0   :  { %v145_v59 = vsel %vm29_vm0, %v135_v58, 0 }
 0x1c1   :  { %1333 = vmatpush3.bf16.msra.mxu0 %v145_v59 }
 0x1c2   :  { %1344 = vmatprep.subr.bf16.mxu0 %v1465_v1 }
 0x1c4   :  { %1335 = vmatmul.mubr.msk.bf16.vlgmr.msra.gmra.mrb[4].mxu0 %vm25_vm2, %v1182_v60 }
 0x1c5   :  { %1346 = vmatprep.mubr.msk.bf16.mxu0 %vm1466_vm1, %v1465_v1 }
 0x297   :  { %v181_v62 = vpop.f32.mrb[4].mxu0 }
 0x298   :  { %v182_v63 = vadd.f32 %v181_v62, %v139_v61  ;;  %v1336_v0 = vpop.f32.mrb[5].mxu0 }
 0x299   :  { %v184_v2 = vpop.f32.mrb[6].mxu0 }
 0x29a   :  { %v187_v3 = vadd.f32 %v182_v63, %v1562_v26  ;;  %v1337_v4 = vpop.f32.mrb[7].mxu0 }
 0x29c   :  { %v188_v5 = vmax.f32 %v187_v3, 0.0 }
 0x29e   :  { %v193_v6 = vpack.c.bf16 %v188_v5, %v188_v5 }
 0x2a0   :  { %v203_v7 = vsel %vm29_vm0, %v193_v6, 0 }
 0x2a1   :  { %1339 = vmatpush3.bf16.msra.mxu1 %v203_v7  ;;  %v528_v7 = vpop.permute.xlu0 %527 }
 0x2a2   :  { %1350 = vmatprep.subr.bf16.mxu1 %v1465_v1 }
 0x2a4   :  { %1341 = vmatmul.mubr.msk.bf16.vlgmr.msra.gmra.mrb[4].mxu1 %vm25_vm2, %v1185_v8 }
 0x2a5   :  { %1352 = vmatprep.mubr.msk.bf16.mxu1 %vm1466_vm1, %v1465_v1 }
 0x377   :  { %v239_v10 = vpop.f32.mrb[4].mxu1 }
 0x378   :  { %v240_v11 = vadd.f32 %v239_v10, %v197_v9  ;;  %v1342_v12 = vpop.f32.mrb[5].mxu1 }
 0x379   :  { %v242_v13 = vpop.f32.mrb[6].mxu1 }
 0x37a   :  { %v245_v14 = vmax.f32 %v240_v11, 0.0  ;;  %v1343_v15 = vpop.f32.mrb[7].mxu1 }
 0x37b   :  { %v1431_v15 = vld [vmem:[%s1732_s1 + $0xa0] sm:$0xff]  }
 0x37c   :  { %v250_v16 = vpack.c.bf16 %v245_v14, %v245_v14  ;;  %v1430_v14 = vld [vmem:[%s1732_s1 + $0x90] sm:$0xff]  }
 0x37e   :  { %v260_v17 = vsel %vm29_vm0, %v250_v16, 0 }
 0x37f   :  { %1345 = vmatpush3.bf16.msra.mxu0 %v260_v17 }
 0x380   :  { %1356 = vmatprep.subr.bf16.mxu0 %v1465_v1 }
 0x382   :  { %1347 = vmatmul.mubr.msk.bf16.vlgmr.msra.gmra.mrb[8].mxu0 %vm25_vm2, %v1188_v18 }
 0x383   :  { %1358 = vmatprep.mubr.msk.bf16.mxu0 %vm1466_vm1, %v1465_v1 }
 0x455   :  { %v296_v20 = vpop.f32.mrb[8].mxu0 }
 0x456   :  { %v297_v21 = vadd.f32 %v296_v20, %v254_v19  ;;  %v1348_v22 = vpop.f32.mrb[9].mxu0  ;;  %v596_v20 = vpop.permute.xlu0 %595 }
 0x457   :  { %v299_v23 = vpop.f32.mrb[10].mxu0 }
 0x458   :  { %v302_v24 = vadd.f32 %v297_v21, %v187_v3  ;;  %v1349_v25 = vpop.f32.mrb[11].mxu0  ;;  %v1429_v3 = vld [vmem:[%s1732_s1 + $0x80] sm:$0xff]  }
 0x45a   :  { %v309_v26 = vpack.c.bf16 %v302_v24, %v302_v24 }
 0x45c   :  { %v329_v27 = vsel %vm29_vm0, %v309_v26, 0 }
 0x45d   :  { %1351 = vmatpush3.bf16.msra.mxu1 %v329_v27  ;;  %v1432_v27 = vld [vmem:[%s1732_s1 + $0xa8] sm:$0xff]  }
 0x45e   :  { %1362 = vmatprep.subr.bf16.mxu1 %v1465_v1 }
 0x460   :  { %1353 = vmatmul.mubr.msk.bf16.vlgmr.msra.gmra.mrb[8].mxu1 %vm25_vm2, %v1426_v28  ;;  %v1433_v28 = vld [vmem:[%s1732_s1 + $0xb0] sm:$0xff]  }
 0x461   :  { %1364 = vmatprep.mubr.msk.bf16.mxu1 %vm1466_vm1, %v1465_v1 }
 0x533   :  { %v365_v30 = vpop.f32.mrb[8].mxu1 }
 0x534   :  { %v366_v31 = vadd.f32 %v365_v30, %v313_v29  ;;  %v1354_v32 = vpop.f32.mrb[9].mxu1  ;;  %v668_v29 = vpop.permute.xlu0 %667 }
 0x535   :  { %v368_v34 = vpop.f32.mrb[10].mxu1 }
 0x536   :  { %v369_v35 = vadd.f32 %v368_v34, %v318_v33  ;;  %v1355_v36 = vpop.f32.mrb[11].mxu1  ;;  %v372_v37 = vmax.f32 %v366_v31, 0.0 }
 0x538   :  { %v373_v38 = vmax.f32 %v369_v35, 0.0  ;;  %v678_v33 = vpop.permute.xlu0 %677 }
 0x53a   :  { %v380_v39 = vpack.c.bf16 %v373_v38, %v372_v37 }
 0x53c   :  { %1357 = vmatpush3.bf16.msra.mxu0 %v380_v39 }
 0x53d   :  { %1368 = vmatprep.subr.bf16.mxu0 %v1465_v1 }
 0x53f   :  { %1359 = vmatmul.mubr.msk.bf16.vlgmr.msra.gmra.mrb[12].mxu0 %vm396_vm3, %v1427_v40 }
 0x540   :  { %1370 = vmatprep.mubr.msk.bf16.mxu0 %vm1466_vm1, %v1465_v1 }
 0x612   :  { %v434_v42 = vpop.f32.mrb[12].mxu0 }
 0x613   :  { %v435_v43 = vadd.f32 %v434_v42, %v384_v41  ;;  %v1360_v44 = vpop.f32.mrb[13].mxu0 }
 0x614   :  { %v437_v46 = vpop.f32.mrb[14].mxu0 }
 0x615   :  { %v438_v47 = vadd.f32 %v437_v46, %v389_v45  ;;  %v1361_v48 = vpop.f32.mrb[15].mxu0  ;;  %v441_v49 = vmax.f32 %v435_v43, 0.0 }
 0x616   :  { %v1435_v48 = vld [vmem:[%s1732_s1 + $0xc0] sm:$0xff]  }
 0x617   :  { %v442_v50 = vmax.f32 %v438_v47, 0.0  ;;  %v1434_v47 = vld [vmem:[%s1732_s1 + $0xb8] sm:$0xff]  }
 0x619   :  { %v449_v51 = vpack.c.bf16 %v442_v50, %v441_v49  ;;  %v769_v50 = vpop.permute.xlu0 %768 }
 0x61b   :  { %1363 = vmatpush3.bf16.msra.mxu1 %v449_v51 }
 0x61c   :  { %1374 = vmatprep.subr.bf16.mxu1 %v1465_v1 }
 0x61e   :  { %1365 = vmatmul.mubr.msk.bf16.vlgmr.msra.gmra.mrb[12].mxu1 %vm396_vm3, %v1428_v52 }
 0x61f   :  { %1376 = vmatprep.mubr.msk.bf16.mxu1 %vm1466_vm1, %v1465_v1  ;;  %v523_v1 = vpop.permute.xlu1 %522 }
 0x623   :  { %v591_v16 = vpop.permute.xlu1 %590 }
 0x627   :  { %v663_v30 = vpop.permute.xlu1 %662 }
 0x62b   :  { %v673_v36 = vpop.permute.xlu1 %672 }
 0x62f   :  { %v764_v49 = vpop.permute.xlu1 %763 }
 0x633   :  { %v774_v51 = vpop.permute.xlu1 %773 }
 0x6f1   :  { %v502_v54 = vpop.f32.mrb[12].mxu1 }
 0x6f2   :  { %v503_v55 = vadd.f32 %v502_v54, %v453_v53  ;;  %v1366_v56 = vpop.f32.mrb[13].mxu1 }
 0x6f3   :  { %v505_v58 = vpop.f32.mrb[14].mxu1 }
 0x6f4   :  { %v509_v59 = vadd.f32 %v503_v55, %v366_v31  ;;  %v506_v60 = vadd.f32 %v505_v58, %v458_v57  ;;  %v1367_v61 = vpop.f32.mrb[15].mxu1  ;;  %v779_v55 = vpop.permute.xlu0 %778 }
 0x6f6   :  { %v510_v62 = vadd.f32 %v506_v60, %v369_v35  ;;  %v511_v63 = vmax.f32 %v509_v59, 0.0 }
 0x6f8   :  { %v512_v0 = vmax.f32 %v510_v62, 0.0 }
 0x6fa   :  { %v519_v2 = vpack.c.bf16 %v512_v0, %v511_v63 }
 0x6fc   :  { %1369 = vmatpush3.bf16.msra.mxu0 %v519_v2 }
 0x6ff   :  { %1371 = vmatmul.mubr.msk.bf16.vlgmr.msra.gmra.mrb[16].mxu0 %vm396_vm3, %v1429_v3 }
 0x700   :  { %1382 = vmatprep.mubr.msk.bf16.mxu0 %vm396_vm3, %v1431_v15 }
 0x7d2   :  { %v572_v4 = vpop.f32.mrb[16].mxu0 }
 0x7d3   :  { %v573_v5 = vadd.f32 %v572_v4, %v523_v1  ;;  %v1372_v6 = vpop.f32.mrb[17].mxu0  ;;  %v1436_v1 = vld [vmem:[%s1732_s1 + $0xc8] sm:$0xff]   ;;  %v1437_v4 = vld [vmem:[%s1732_s1 + $0xd0] sm:$0xff]  }
 0x7d4   :  { %v575_v8 = vpop.f32.mrb[18].mxu0  ;;  %v871_v6 = vpop.permute.xlu0 %870 }
 0x7d5   :  { %v576_v9 = vadd.f32 %v575_v8, %v528_v7  ;;  %v1373_v10 = vpop.f32.mrb[19].mxu0  ;;  %v579_v11 = vmax.f32 %v573_v5, 0.0  ;;  %v866_v5 = vpop.permute.xlu1 %865 }
 0x7d7   :  { %v580_v12 = vmax.f32 %v576_v9, 0.0 }
 0x7d8   :  { %v881_v10 = vpop.permute.xlu0 %880 }
 0x7d9   :  { %v587_v13 = vpack.c.bf16 %v580_v12, %v579_v11  ;;  %v876_v8 = vpop.permute.xlu1 %875 }
 0x7db   :  { %1375 = vmatpush3.bf16.msra.mxu1 %v587_v13 }
 0x7de   :  { %1377 = vmatmul.mubr.msk.bf16.vlgmr.msra.gmra.mrb[16].mxu1 %vm396_vm3, %v1430_v14 }
 0x7df   :  { %1390 = vmatprep.mubr.msk.bf16.mxu1 %vm791_vm4, %v1433_v28  ;;  %v1439_v28 = vld [vmem:[%s1732_s1 + $0xe0] sm:$0xff]  }
 0x8b1   :  { %v640_v17 = vpop.f32.mrb[16].mxu1 }
 0x8b2   :  { %v641_v18 = vadd.f32 %v640_v17, %v591_v16  ;;  %v1378_v19 = vpop.f32.mrb[17].mxu1 }
 0x8b3   :  { %v643_v21 = vpop.f32.mrb[18].mxu1 }
 0x8b4   :  { %v644_v22 = vadd.f32 %v643_v21, %v596_v20  ;;  %v1379_v23 = vpop.f32.mrb[19].mxu1  ;;  %v647_v24 = vadd.f32 %v641_v18, %v509_v59 }
 0x8b6   :  { %v648_v25 = vadd.f32 %v644_v22, %v510_v62 }
 0x8b8   :  { %v659_v26 = vpack.c.bf16 %v648_v25, %v647_v24 }
 0x8ba   :  { %1380 = vmatprep.subr.bf16.mxu0 %v659_v26 }
 0x8bb   :  { %1381 = vmatpush3.bf16.msra.mxu0 %v659_v26 }
 0x8be   :  { %1383 = vmatmul.mubr.msk.bf16.vlgmr.msra.gmra.mrb[20].mxu0 %vm396_vm3, %v1432_v27  ;;  %v1438_v27 = vld [vmem:[%s1732_s1 + $0xd8] sm:$0xff]  }
 0x8bf   :  { %1398 = vmatprep.mubr.msk.bf16.mxu0 %vm791_vm4, %v1435_v48 }
 0x991   :  { %v1384_v31 = vpop.f32.mrb[20].mxu0 }
 0x992   :  { %v730_v32 = vpop.f32.mrb[21].mxu0  ;;  %v739_v39 = vadd.f32 %v1384_v31, %v673_v36 }
 0x993   :  { %v731_v34 = vadd.f32 %v730_v32, %v663_v30  ;;  %v1385_v35 = vpop.f32.mrb[22].mxu0  ;;  %v976_v30 = vpop.permute.xlu0 %975 }
 0x994   :  { %v742_v37 = vadd.f32 %v1385_v35, %v678_v33  ;;  %v733_v38 = vpop.f32.mrb[23].mxu0  ;;  %v747_v44 = vmax.f32 %v739_v39, 0.0 }
 0x995   :  { %v734_v40 = vadd.f32 %v733_v38, %v668_v29  ;;  %v745_v41 = vmax.f32 %v731_v34, 0.0  ;;  %v971_v29 = vpop.permute.xlu1 %970 }
 0x996   :  { %v748_v42 = vmax.f32 %v742_v37, 0.0 }
 0x997   :  { %v746_v43 = vmax.f32 %v734_v40, 0.0  ;;  %v986_v35 = vpop.permute.xlu0 %985 }
 0x998   :  { %v760_v46 = vpack.c.bf16 %v748_v42, %v747_v44 }
 0x999   :  { %v759_v45 = vpack.c.bf16 %v746_v43, %v745_v41  ;;  %v981_v31 = vpop.permute.xlu1 %980 }
 0x99b   :  { %1386 = vmatprep.subr.bf16.mxu1 %v759_v45 }
 0x99c   :  { %1387 = vmatpush3.bf16.msra.mxu1 %v759_v45 }
 0x99d   :  { %1388 = vmatprep.subr.bf16.mxu1 %v760_v46  ;;  %v1072_v48 = vpop.permute.xlu1 %1071 }
 0x9a0   :  { %1389 = vmatpush3.bf16.msra.mxu1 %v760_v46 }
 0x9a3   :  { %1391 = vmatmul.mubr.msk.bf16.vlgmr.msra.gmra.mrb[20].mxu1 %vm791_vm4, %v1434_v47  ;;  %v1440_v47 = vld [vmem:[%s1732_s1 + $0xe8] sm:$0xff]   ;;  %s1441_s1 = scalar_lea.vmem %s1168_s11, 512 }
 0x9a4   :  { %1406 = vmatprep.mubr.msk.bf16.mxu1 %vm791_vm4, %v1437_v4  ;;  %p1442_p0 = scmp.ne.s32.totalorder %s1168_s11, %s1441_s1  ;;  %p1447_p2 = scmp.lt.s32.totalorder %s1441_s1, %s1441_s1 }
 0x9a6   :  { %p1448_p3 = por %p1447_p2, %p1446_p1 }
 0x9a8   :  { %p1449_p4 = pnand %p1448_p3, %p1442_p0 }
 0xa76   :  { %v1392_v52 = vpop.f32.mrb[20].mxu1 }
 0xa77   :  { %v841_v53 = vadd.f32 %v1392_v52, %v774_v51  ;;  %v832_v54 = vpop.f32.mrb[21].mxu1 }
 0xa78   :  { %v833_v56 = vadd.f32 %v832_v54, %v764_v49  ;;  %v1393_v57 = vpop.f32.mrb[22].mxu1  ;;  %v1077_v49 = vpop.permute.xlu0 %1076 }
 0xa79   :  { %v844_v58 = vadd.f32 %v1393_v57, %v779_v55  ;;  %v835_v59 = vpop.f32.mrb[23].mxu1  ;;  %v849_v61 = vmax.f32 %v841_v53, 0.0 }
 0xa7a   :  { %v836_v60 = vadd.f32 %v835_v59, %v769_v50  ;;  %v847_v63 = vmax.f32 %v833_v56, 0.0  ;;  %v1082_v50 = vpop.permute.xlu1 %1081 }
 0xa7b   :  { %v850_v62 = vmax.f32 %v844_v58, 0.0 }
 0xa7c   :  { %v848_v0 = vmax.f32 %v836_v60, 0.0  ;;  %v1087_v54 = vpop.permute.xlu0 %1086 }
 0xa7d   :  { %v862_v2 = vpack.c.bf16 %v850_v62, %v849_v61 }
 0xa7e   :  { %v861_v3 = vpack.c.bf16 %v848_v0, %v847_v63 }
 0xa80   :  { %1394 = vmatprep.subr.bf16.mxu0 %v861_v3 }
 0xa81   :  { %1395 = vmatpush3.bf16.msra.mxu0 %v861_v3 }
 0xa82   :  { %1396 = vmatprep.subr.bf16.mxu0 %v862_v2 }
 0xa85   :  { %1397 = vmatpush3.bf16.msra.mxu0 %v862_v2 }
 0xa88   :  { %1399 = vmatmul.mubr.msk.bf16.vlgmr.msra.gmra.mrb[24].mxu0 %vm791_vm4, %v1436_v1 }
 0xa89   :  { %1414 = vmatprep.mubr.msk.bf16.mxu0 %vm791_vm4, %v1439_v28 }
 0xb5b   :  { %v1400_v7 = vpop.f32.mrb[24].mxu0 }
 0xb5c   :  { %v933_v9 = vpop.f32.mrb[25].mxu0  ;;  %v942_v11 = vadd.f32 %v1400_v7, %v876_v8 }
 0xb5d   :  { %v934_v12 = vadd.f32 %v933_v9, %v866_v5  ;;  %v1401_v13 = vpop.f32.mrb[26].mxu0 }
 0xb5e   :  { %v945_v14 = vadd.f32 %v1401_v13, %v881_v10  ;;  %v936_v15 = vpop.f32.mrb[27].mxu0  ;;  %v950_v19 = vadd.f32 %v942_v11, %v739_v39 }
 0xb5f   :  { %v948_v16 = vadd.f32 %v934_v12, %v731_v34  ;;  %v937_v17 = vadd.f32 %v936_v15, %v871_v6 }
 0xb60   :  { %v951_v18 = vadd.f32 %v945_v14, %v742_v37  ;;  %v954_v24 = vmax.f32 %v950_v19, 0.0 }
 0xb61   :  { %v949_v20 = vadd.f32 %v937_v17, %v734_v40  ;;  %v952_v21 = vmax.f32 %v948_v16, 0.0 }
 0xb62   :  { %v955_v22 = vmax.f32 %v951_v18, 0.0 }
 0xb63   :  { %v953_v23 = vmax.f32 %v949_v20, 0.0 }
 0xb64   :  { %v967_v26 = vpack.c.bf16 %v955_v22, %v954_v24 }
 0xb65   :  { %v966_v25 = vpack.c.bf16 %v953_v23, %v952_v21 }
 0xb67   :  { %1402 = vmatprep.subr.bf16.mxu1 %v966_v25 }
 0xb68   :  { %1403 = vmatpush3.bf16.msra.mxu1 %v966_v25 }
 0xb69   :  { %1404 = vmatprep.subr.bf16.mxu1 %v967_v26 }
 0xb6c   :  { %1405 = vmatpush3.bf16.msra.mxu1 %v967_v26 }
 0xb6f   :  { %1407 = vmatmul.mubr.msk.bf16.vlgmr.msra.gmra.mrb[24].mxu1 %vm791_vm4, %v1438_v27 }
 0xc42   :  { %v1408_v32 = vpop.f32.mrb[24].mxu1 }
 0xc43   :  { %v1047_v33 = vadd.f32 %v1408_v32, %v981_v31  ;;  %v1038_v34 = vpop.f32.mrb[25].mxu1 }
 0xc44   :  { %v1039_v36 = vadd.f32 %v1038_v34, %v971_v29  ;;  %v1409_v37 = vpop.f32.mrb[26].mxu1 }
 0xc45   :  { %v1050_v38 = vadd.f32 %v1409_v37, %v986_v35  ;;  %v1041_v39 = vpop.f32.mrb[27].mxu1  ;;  %v1055_v41 = vmax.f32 %v1047_v33, 0.0 }
 0xc46   :  { %v1042_v40 = vadd.f32 %v1041_v39, %v976_v30  ;;  %v1053_v43 = vmax.f32 %v1039_v36, 0.0 }
 0xc47   :  { %v1056_v42 = vmax.f32 %v1050_v38, 0.0 }
 0xc48   :  { %v1054_v44 = vmax.f32 %v1042_v40, 0.0 }
 0xc49   :  { %v1068_v45 = vpack.c.bf16 %v1056_v42, %v1055_v41 }
 0xc4a   :  { %v1067_v46 = vpack.c.bf16 %v1054_v44, %v1053_v43 }
 0xc4c   :  { %1410 = vmatprep.subr.bf16.mxu0 %v1067_v46 }
 0xc4d   :  { %1411 = vmatpush3.bf16.msra.mxu0 %v1067_v46 }
 0xc4e   :  { %1412 = vmatprep.subr.bf16.mxu0 %v1068_v45 }
 0xc51   :  { %1413 = vmatpush3.bf16.msra.mxu0 %v1068_v45 }
 0xc54   :  { %1415 = vmatmul.mubr.msk.bf16.vlgmr.msra.gmra.mrb[28].mxu0 %vm791_vm4, %v1440_v47 }
 0xd27   :  { %v1416_v51 = vpop.f32.mrb[28].mxu0 }
 0xd28   :  { %v1148_v52 = vadd.f32 %v1416_v51, %v1082_v50  ;;  %v1139_v53 = vpop.f32.mrb[29].mxu0 }
 0xd29   :  { %v1140_v55 = vadd.f32 %v1139_v53, %v1072_v48  ;;  %v1417_v56 = vpop.f32.mrb[30].mxu0 }
 0xd2a   :  { %v1156_v57 = vadd.f32 %v1148_v52, %v950_v19  ;;  %v1151_v58 = vadd.f32 %v1417_v56, %v1087_v54  ;;  %v1142_v59 = vpop.f32.mrb[31].mxu0 }
 0xd2b   :  { %v1154_v60 = vadd.f32 %v1140_v55, %v948_v16  ;;  %v1143_v61 = vadd.f32 %v1142_v59, %v1077_v49 }
 0xd2c   :  { %1160 = vst [vmem:[#allocation2 + $0x10] sm:$0xff] %v1156_v57  ;;  %v1157_v62 = vadd.f32 %v1151_v58, %v951_v18 }
 0xd2d   :  { %1158 = vst [vmem:[#allocation2] sm:$0xff] %v1154_v60  ;;  %v1155_v63 = vadd.f32 %v1143_v61, %v949_v20 }
 0xd2e   :  { %1161 = vst [vmem:[#allocation2 + $0x18] sm:$0xff] %v1157_v62 }
 0xd2f   :  { %1159 = vst [vmem:[#allocation2 + $0x8] sm:$0xff] %v1155_v63 }
 0xd30   :  { %1452 = shalt.err (!%p1449_p4)
}
 0xd31   :  { %s1453_s14 = scalar_lea.hbm %s1734_s3, 512 }
 0xd32   :  { %p1454_p5 = scmp.ne.s32.totalorder %s1734_s3, %s1453_s14  ;;  %p1457_p6 = scmp.lt.u32.totalorder %s1453_s14, %s1734_s3 }
 0xd34   :  { %p1459_p7 = pnand %p1457_p6, %p1454_p5 }
 0xd36   :  { %1462 = shalt.err (!%p1459_p7)
}
 0xd37   :  { %s1469_s18 = smov 128   ;;  %s1470_s19 = smov 8  }
 0xd38   :  { %1173 = dma.vmem_to_hbm [thread:$0]  %s1168_s11, 512, %s1734_s3, [#allocation3], %s1469_s18, %s1469_s18, %s1470_s19  }
 0xd39   :  { %1463 = dma.done.wait [#allocation3], 512  }
 0xd3a   :  { %1464 = vsyncadd [#allocation3], 4294966784 }
 0xd3b   :  { %1177 = vsyncpa [#allocation3], 1 }

</bundles_post_ra>
